<compile_context>
chip_gen: v5e
topology: v5e:2x2
jax: 0.10.0
libtpu: 0.0.40
codegen_flags: <defaults>
</compile_context>

<pallas_src>
import functools

import jax
import jax.numpy as jnp
from jax import lax
from jax.experimental import pallas as pl
from jax.experimental.pallas import tpu as pltpu


def _make_mlp_kernel(n_hidden, compute_dtype):
    """Kernel body: full MLP forward on one lane-dense batch tile."""

    def kernel(x_ref, edge_ref, wl_ref, wh_ref, bh_ref, o_ref):
        # x_ref:    (1, tile_n)                 batch on lanes, f32
        # edge_ref: (neurons, 3)                cols = [w_first, b_first, b_last]
        # wl_ref:   (1, neurons)                last-layer weight row (compute_dtype)
        # wh_ref:   (max(n_hidden,1), neurons, neurons)   (out, in), compute_dtype
        # bh_ref:   (max(n_hidden,1), neurons, 1)         f32
        x_row = x_ref[...]                      # (1, tile_n)
        edge = edge_ref[...]                    # (neurons, 3)
        w0 = edge[:, 0:1]                       # (neurons, 1)
        b0 = edge[:, 1:2]                       # (neurons, 1)
        bl = edge[0:1, 2:3]                     # (1, 1)

        # First layer (1 -> neurons): outer-product broadcast on the VPU (no MXU).
        z0 = w0 * x_row + b0                    # (neurons, tile_n) f32
        h = jnp.tanh(z0.astype(compute_dtype))  # (neurons, tile_n) compute_dtype

        # Hidden layers (neurons -> neurons): W @ h on the MXU, f32 accumulation.
        if n_hidden > 0:
            def body(li, h):
                w = wh_ref[li]                  # (neurons, neurons) compute_dtype
                b = bh_ref[li]                  # (neurons, 1) f32
                z = jnp.dot(w, h, preferred_element_type=jnp.float32) + b
                return jnp.tanh(z.astype(compute_dtype))

            h = lax.fori_loop(0, n_hidden, body, h, unroll=(n_hidden <= 8))

        # Last layer (neurons -> 1): (1, neurons) @ (neurons, tile_n) on the MXU.
        out = jnp.dot(wl_ref[...], h, preferred_element_type=jnp.float32) + bl
        o_ref[...] = out.astype(o_ref.dtype)    # lane-dense, unmasked store

    return kernel


def default_compute_dtype():
    """bf16 activations on chips with a bf16 VPU/EUP (v6e/v7x), f32 otherwise."""
    try:
        kind = jax.devices()[0].device_kind.lower()
    except Exception:  # no device info -> stay safe
        return jnp.float32
    if any(tag in kind for tag in ("v6", "v7", "tpu7")):
        return jnp.bfloat16
    return jnp.float32


def mlp_forward_pallas(x, params, *, max_tile_n=8192, compute_dtype=jnp.float32):
    """x: (N, 1) f32.  params: list of (W, b) in torch layout, W=(out, in), b=(out,)."""
    N = x.shape[0]
    n_layers = len(params)
    assert n_layers >= 2
    neurons = params[0][0].shape[0]
    n_hidden = n_layers - 2
    compute_dtype = jnp.dtype(compute_dtype)

    # Pack first/last layer params: one lane-padded column array + one row array.
    w_first, b_first = params[0]                 # (neurons, 1), (neurons,)
    w_last, b_last = params[-1]                  # (1, neurons), (1,)
    edge = jnp.concatenate(
        [
            w_first.reshape(neurons, 1).astype(jnp.float32),
            b_first.reshape(neurons, 1).astype(jnp.float32),
            jnp.broadcast_to(b_last.reshape(1, 1).astype(jnp.float32), (neurons, 1)),
        ],
        axis=1,
    )                                            # (neurons, 3)
    wl_row = w_last.reshape(1, neurons).astype(compute_dtype)   # (1, neurons)

    if n_hidden > 0:
        wh = jnp.stack([w for w, _ in params[1:-1]]).astype(compute_dtype)        # (H, n, n)
        bh = jnp.stack([b.reshape(neurons, 1) for _, b in params[1:-1]])          # (H, n, 1)
        bh = bh.astype(jnp.float32)
    else:
        wh = jnp.zeros((1, neurons, neurons), compute_dtype)
        bh = jnp.zeros((1, neurons, 1), jnp.float32)

    # Lane-dense layout: batch on lanes.  Choose tile_n so that
    #  - tiles are multiples of 128,
    #  - the grid has >= 2 steps whenever n_pad >= 256 (v7x megacore sharding),
    #  - tiles are large (<= max_tile_n) to amortize per-step overhead.
    n_pad128 = pl.cdiv(N, 128) * 128
    if n_pad128 < 256:
        tile_n = n_pad128                        # tiny N: single grid step
    else:
        tile_n = min(max_tile_n, (n_pad128 // 2) // 128 * 128)
    n_pad = pl.cdiv(N, tile_n) * tile_n
    grid = (n_pad // tile_n,)

    x_row = x.reshape(1, N).astype(jnp.float32)
    if n_pad != N:
        x_row = jnp.pad(x_row, ((0, 0), (0, n_pad - N)))

    kernel = _make_mlp_kernel(n_hidden, compute_dtype)

    out_row = pl.pallas_call(
        kernel,
        out_shape=jax.ShapeDtypeStruct((1, n_pad), jnp.float32),
        grid_spec=pltpu.PrefetchScalarGridSpec(
            num_scalar_prefetch=0,
            grid=grid,
            in_specs=[
                pl.BlockSpec((1, tile_n), lambda i: (0, i)),
                pl.BlockSpec(edge.shape, lambda i: (0, 0)),
                pl.BlockSpec(wl_row.shape, lambda i: (0, 0)),
                pl.BlockSpec(wh.shape, lambda i: (0, 0, 0)),
                pl.BlockSpec(bh.shape, lambda i: (0, 0, 0)),
            ],
            out_specs=pl.BlockSpec((1, tile_n), lambda i: (0, i)),
        ),
        compiler_params=pltpu.CompilerParams(
            dimension_semantics=("parallel",),
            vmem_limit_bytes=32 * 1024 * 1024,
        ),
    )(x_row, edge, wl_row, wh, bh)

    return out_row[0, :N].reshape(N, 1)


def init_params(key, neurons, n_layers):
    """Deterministic init mimicking torch.nn.Linear default (uniform +/- 1/sqrt(fan_in)).

    Weights kept in torch layout: W=(out_features, in_features), b=(out_features,).
    """
    sizes = [1] + [neurons] * (n_layers - 1) + [1]
    params = []
    for li in range(n_layers):
        fan_in, fan_out = sizes[li], sizes[li + 1]
        key, kw, kb = jax.random.split(key, 3)
        bound = 1.0 / (fan_in ** 0.5)
        w = jax.random.uniform(kw, (fan_out, fan_in), jnp.float32, -bound, bound)
        b = jax.random.uniform(kb, (fan_out,), jnp.float32, -bound, bound)
        params.append((w, b))
    return params


def mlp_forward_ref(x, params):
    """Pure-JAX reference, identical math to torch: x @ W.T + b."""
    h = x
    for li, (w, b) in enumerate(params):
        h = h @ w.T + b
        if li < len(params) - 1:
            h = jnp.tanh(h)
    return h


if __name__ == "__main__":
    neurons = 32
    n_layers = 4          # layers: 1->32, 32->32, 32->32, 32->1
    batch = 200           # not a multiple of 128: exercises pad/slice and a 2-step grid

    key = jax.random.PRNGKey(0)
    key, kx = jax.random.split(key)
    x = jax.random.uniform(kx, (batch, 1), jnp.float32, -1.0, 1.0)
    params = init_params(key, neurons, n_layers)
    ref = mlp_forward_ref(x, params)

    # 1) f32 path: runs on every TPU generation, strict tolerance.
    fwd_f32 = jax.jit(functools.partial(mlp_forward_pallas, compute_dtype=jnp.float32))
    out_f32 = jax.block_until_ready(fwd_f32(x, params))
    assert out_f32.shape == (batch, 1)
    assert jnp.allclose(out_f32, ref, atol=1e-5, rtol=1e-5), "f32 mismatch vs reference"

    # 2) Auto precision: bf16 tanh / MXU matmuls on v6e/v7x, f32 on v5e.
    cdt = jnp.dtype(default_compute_dtype())
    fwd_auto = jax.jit(functools.partial(mlp_forward_pallas, compute_dtype=cdt))
    out_auto = jax.block_until_ready(fwd_auto(x, params))
    assert out_auto.shape == (batch, 1)
    tol = 1e-5 if cdt == jnp.dtype(jnp.float32) else 5e-2
    assert jnp.allclose(out_auto, ref, atol=tol, rtol=tol), "auto-precision mismatch vs reference"

    print("KERNEL_OK")
</pallas_src>

<mosaic_0001>
module attributes {stable_mosaic.version = 11 : i64} {
  func.func @kernel(%arg0: i32, %arg1: memref<1x128xf32, #tpu.memory_space<vmem>>, %arg2: memref<32x3xf32, #tpu.memory_space<vmem>>, %arg3: memref<1x32xf32, #tpu.memory_space<vmem>>, %arg4: memref<2x32x32xf32, #tpu.memory_space<vmem>>, %arg5: memref<2x32x1xf32, #tpu.memory_space<vmem>>, %arg6: memref<1x128xf32, #tpu.memory_space<vmem>>) attributes {dimension_semantics = [#tpu.dimension_semantics<parallel>], iteration_bounds = array<i64: 2>, scalar_prefetch = 0 : i64, scratch_operands = 0 : i64, tpu.core_type = #tpu.core_type<tc>, window_params = [{transform_indices = @transform_0, window_bounds = array<i64: 1, 128>}, {pipeline_mode = #tpu.pipeline_mode<synchronous>, transform_indices = @transform_1, window_bounds = array<i64: 32, 3>}, {pipeline_mode = #tpu.pipeline_mode<synchronous>, transform_indices = @transform_2, window_bounds = array<i64: 1, 32>}, {pipeline_mode = #tpu.pipeline_mode<synchronous>, transform_indices = @transform_3, window_bounds = array<i64: 2, 32, 32>}, {pipeline_mode = #tpu.pipeline_mode<synchronous>, transform_indices = @transform_4, window_bounds = array<i64: 2, 32, 1>}, {transform_indices = @transform_5, window_bounds = array<i64: 1, 128>}]} {
    %c0 = arith.constant 0 : index
    %c0_0 = arith.constant 0 : index
    %0 = vector.load %arg1[%c0, %c0_0] : memref<1x128xf32, #tpu.memory_space<vmem>>, vector<1x128xf32>
    %c0_1 = arith.constant 0 : index
    %c0_2 = arith.constant 0 : index
    %1 = vector.load %arg2[%c0_1, %c0_2] : memref<32x3xf32, #tpu.memory_space<vmem>>, vector<32x3xf32>
    %2 = vector.extract_strided_slice %1 {offsets = [0, 0], sizes = [32, 1], strides = [1, 1]} : vector<32x3xf32> to vector<32x1xf32>
    %3 = vector.extract_strided_slice %1 {offsets = [0, 1], sizes = [32, 1], strides = [1, 1]} : vector<32x3xf32> to vector<32x1xf32>
    %4 = vector.extract_strided_slice %1 {offsets = [0, 2], sizes = [1, 1], strides = [1, 1]} : vector<32x3xf32> to vector<1x1xf32>
    %5 = vector.broadcast %2 : vector<32x1xf32> to vector<32x128xf32>
    %6 = vector.broadcast %0 : vector<1x128xf32> to vector<32x128xf32>
    %7 = arith.mulf %5, %6 : vector<32x128xf32>
    %8 = vector.broadcast %3 : vector<32x1xf32> to vector<32x128xf32>
    %9 = arith.addf %7, %8 : vector<32x128xf32>
    %10 = math.tanh %9 : vector<32x128xf32>
    %c0_i32 = arith.constant 0 : i32
    %11 = arith.index_cast %c0_i32 : i32 to index
    %c0_3 = arith.constant 0 : index
    %c0_4 = arith.constant 0 : index
    %12 = vector.load %arg4[%11, %c0_3, %c0_4] : memref<2x32x32xf32, #tpu.memory_space<vmem>>, vector<1x32x32xf32>
    %13 = vector.shape_cast %12 : vector<1x32x32xf32> to vector<32x32xf32>
    %14 = arith.index_cast %c0_i32 : i32 to index
    %c0_5 = arith.constant 0 : index
    %c0_6 = arith.constant 0 : index
    %15 = vector.load %arg5[%14, %c0_5, %c0_6] : memref<2x32x1xf32, #tpu.memory_space<vmem>>, vector<1x32x1xf32>
    %16 = vector.shape_cast %15 : vector<1x32x1xf32> to vector<32x1xf32>
    %cst = arith.constant dense<0.000000e+00> : vector<32x128xf32>
    %17 = tpu.matmul %13, %10, %cst {dimension_numbers = #tpu.dot_dimension_numbers<[1], [0], [0], [1], [0, 0, 1, 1], [], []>} : vector<32x32xf32>, vector<32x128xf32>, vector<32x128xf32> -> vector<32x128xf32>
    %18 = vector.broadcast %16 : vector<32x1xf32> to vector<32x128xf32>
    %19 = arith.addf %17, %18 : vector<32x128xf32>
    %20 = math.tanh %19 : vector<32x128xf32>
    %c1_i32 = arith.constant 1 : i32
    %21 = arith.index_cast %c1_i32 : i32 to index
    %c0_7 = arith.constant 0 : index
    %c0_8 = arith.constant 0 : index
    %22 = vector.load %arg4[%21, %c0_7, %c0_8] : memref<2x32x32xf32, #tpu.memory_space<vmem>>, vector<1x32x32xf32>
    %23 = vector.shape_cast %22 : vector<1x32x32xf32> to vector<32x32xf32>
    %24 = arith.index_cast %c1_i32 : i32 to index
    %c0_9 = arith.constant 0 : index
    %c0_10 = arith.constant 0 : index
    %25 = vector.load %arg5[%24, %c0_9, %c0_10] : memref<2x32x1xf32, #tpu.memory_space<vmem>>, vector<1x32x1xf32>
    %26 = vector.shape_cast %25 : vector<1x32x1xf32> to vector<32x1xf32>
    %cst_11 = arith.constant dense<0.000000e+00> : vector<32x128xf32>
    %27 = tpu.matmul %23, %20, %cst_11 {dimension_numbers = #tpu.dot_dimension_numbers<[1], [0], [0], [1], [0, 0, 1, 1], [], []>} : vector<32x32xf32>, vector<32x128xf32>, vector<32x128xf32> -> vector<32x128xf32>
    %28 = vector.broadcast %26 : vector<32x1xf32> to vector<32x128xf32>
    %29 = arith.addf %27, %28 : vector<32x128xf32>
    %30 = math.tanh %29 : vector<32x128xf32>
    %c2_i32 = arith.constant 2 : i32
    %c0_12 = arith.constant 0 : index
    %c0_13 = arith.constant 0 : index
    %31 = vector.load %arg3[%c0_12, %c0_13] : memref<1x32xf32, #tpu.memory_space<vmem>>, vector<1x32xf32>
    %cst_14 = arith.constant dense<0.000000e+00> : vector<1x128xf32>
    %32 = tpu.matmul %31, %30, %cst_14 {dimension_numbers = #tpu.dot_dimension_numbers<[1], [0], [0], [1], [0, 0, 1, 1], [], []>} : vector<1x32xf32>, vector<32x128xf32>, vector<1x128xf32> -> vector<1x128xf32>
    %33 = vector.broadcast %4 : vector<1x1xf32> to vector<1x128xf32>
    %34 = arith.addf %32, %33 : vector<1x128xf32>
    %c0_15 = arith.constant 0 : index
    %c0_16 = arith.constant 0 : index
    %35 = vector.load %arg6[%c0_15, %c0_16] : memref<1x128xf32, #tpu.memory_space<vmem>>, vector<1x128xf32>
    tpu.vector_store %arg6[%c0_15, %c0_16], %34 {strides = array<i32>} : memref<1x128xf32, #tpu.memory_space<vmem>>, vector<1x128xf32>,
    return
  }
  func.func @transform_0(%arg0: i32) -> (i32, i32) {
    %c0_i32 = arith.constant 0 : i32
    %c0_i32_0 = arith.constant 0 : i32
    return %c0_i32, %arg0 : i32, i32
  }
  func.func @transform_1(%arg0: i32) -> (i32, i32) {
    %c0_i32 = arith.constant 0 : i32
    %c0_i32_0 = arith.constant 0 : i32
    %c0_i32_1 = arith.constant 0 : i32
    return %c0_i32, %c0_i32_0 : i32, i32
  }
  func.func @transform_2(%arg0: i32) -> (i32, i32) {
    %c0_i32 = arith.constant 0 : i32
    %c0_i32_0 = arith.constant 0 : i32
    %c0_i32_1 = arith.constant 0 : i32
    return %c0_i32, %c0_i32_0 : i32, i32
  }
  func.func @transform_3(%arg0: i32) -> (i32, i32, i32) {
    %c0_i32 = arith.constant 0 : i32
    %c0_i32_0 = arith.constant 0 : i32
    %c0_i32_1 = arith.constant 0 : i32
    %c0_i32_2 = arith.constant 0 : i32
    return %c0_i32, %c0_i32_0, %c0_i32_1 : i32, i32, i32
  }
  func.func @transform_4(%arg0: i32) -> (i32, i32, i32) {
    %c0_i32 = arith.constant 0 : i32
    %c0_i32_0 = arith.constant 0 : i32
    %c0_i32_1 = arith.constant 0 : i32
    %c0_i32_2 = arith.constant 0 : i32
    return %c0_i32, %c0_i32_0, %c0_i32_1 : i32, i32, i32
  }
  func.func @transform_5(%arg0: i32) -> (i32, i32) {
    %c0_i32 = arith.constant 0 : i32
    %c0_i32_0 = arith.constant 0 : i32
    return %c0_i32, %arg0 : i32, i32
  }
}

</mosaic_0001>

<bundles_post_ra>
// kernel: mlp_forward_pallas.1
= control target key start
LH: loop header
LB: loop body
LE: loop exit
PB: predicated region body
PF: predicated region fallthrough
CT: control target
= control target key end

     0   :  { %s612_s18 = smov 0   ;;  %s710_s0 = inlined_call_operand.vmem [shape: f32[1,256], index: 0, kind: input, shape index: {}]   ;;  %s711_s1 = inlined_call_operand.vmem [shape: f32[32,3], index: 1, kind: input, shape index: {}]   ;;  %s712_s2 = inlined_call_operand.vmem [shape: f32[1,32], index: 2, kind: input, shape index: {}]   ;;  %s713_s3 = inlined_call_operand.vmem [shape: f32[2,32,32], index: 3, kind: input, shape index: {}]   ;;  %s714_s4 = inlined_call_operand.vmem [shape: f32[2,32,1], index: 4, kind: input, shape index: {}]   ;;  %s715_s5 = inlined_call_operand.vmem [shape: f32[1,256], index: 5, kind: output, shape index: {}]  }
   0x1 LB: > { %s493_s19 = sadd.s32 4294967295, %s577_s18   ;;  %p497_p0 = scmp.ge.s32.totalorder %s577_s18, 1  ;;  %s577_s18 = sphi %s612_s18, %s15_s18  }
   0x2   : > { %p185_p1 = scmp.lt.s32.totalorder %s577_s18, 3 }
   0x4   : > { %p186_p2 = pnand %p497_p0, %p185_p1 }
   0x5   : > { %p209_p3 = scmp.lt.s32.totalorder (!%p186_p2), %s493_s19, 1 }
   0x6   : > { %189 = sbr.rel (%p186_p2) target bundleno = 614 (0x266), region = 40 }
   0xb   : > { %v219_v0 = vld [vmem:[%s711_s1 + $0x18] sm:$0xff]  ;;  %v218_v1 = vld [vmem:[%s711_s1 + $0x10] sm:$0xff]  ;;  %v579_v2 = vmov 1   ;;  %v580_v3 = vmov 0   ;;  %s717_s19 = smov (!%p209_p3, %s493_s19), 1  ;;  %v635_v4 = vld [vmem:[%s711_s1] sm:$0xff] }
   0xc   : > { %539 = vset.pattern.permute.xlu2 %v579_v2  ;;  %536 = vset.pattern.permute.xlu0 %v580_v3  ;;  %s211_s26 = scalar_lea.vmem %s710_s0, %s717_s19  ;;  %v217_v5 = vld [vmem:[%s711_s1 + $0x8] sm:$0xff]  ;;  %v278_v6 = vld [vmem:[%s714_s4 + $0x18] sm:$0xff]  ;;  %v508_v8 = vld [vmem:[%s714_s4 + $0x30] sm:$0xff]  ;;  %vm299_vm0 = vcmask 261120   ;;  %v581_v60 = vmov 2   ;;  %s214_s21 = scalar_lea.vmem %s715_s5, %s717_s19 }
   0xd   : > { %537 = vset.pattern.permute.xlu1 %v579_v2  ;;  %237 = vperm.xlu0 %536, %v219_v0   ;;  %v276_v7 = vld [vmem:[%s714_s4 + $0x8] sm:$0xff]  ;;  %v506_v9 = vld [vmem:[%s714_s4 + $0x20] sm:$0xff]  ;;  %v277_v21 = vld [vmem:[%s714_s4 + $0x10] sm:$0xff] }
   0xe   : > { %256 = vperm.xlu2 %539, %v218_v1   ;;  %260 = vperm.xlu1 %537, %v219_v0   ;;  %v546_v10 = vld [vmem:[%s211_s26] ss:$0 sm:$0xff]  ;;  %v509_v31 = vld [vmem:[%s714_s4 + $0x38] sm:$0xff]  ;;  %v272_v33 = vld [vmem:[%s713_s3 + $0x8] sm:$0xff] }
   0xf   : > { %v275_v23 = vld [vmem:[%s714_s4] sm:$0xff]  ;;  %v507_v36 = vld [vmem:[%s714_s4 + $0x28] sm:$0xff]  ;;  %v273_v37 = vld [vmem:[%s713_s3 + $0x10] sm:$0xff] }
  0x10   : > { %v271_v34 = vld [vmem:[%s713_s3] sm:$0xff]  ;;  %v274_v38 = vld [vmem:[%s713_s3 + $0x18] sm:$0xff]  ;;  %v503_v56 = vld [vmem:[%s713_s3 + $0x28] sm:$0xff] }
  0x11   : > { %v502_v55 = vld [vmem:[%s713_s3 + $0x20] sm:$0xff]  ;;  %v504_v57 = vld [vmem:[%s713_s3 + $0x30] sm:$0xff]  ;;  %v505_v58 = vld [vmem:[%s713_s3 + $0x38] sm:$0xff] }
  0x15   : > { %232 = vperm.xlu0 %536, %v218_v1  }
  0x16   : > { %540 = vset.pattern.permute.xlu2 %v580_v3  ;;  %538 = vset.pattern.permute.xlu1 %v580_v3 }
  0x17   : > { %222 = vperm.xlu2 %540, %v635_v4   ;;  %227 = vperm.xlu1 %538, %v217_v5  }
  0x1d   : > { %541 = vset.pattern.permute.xlu0 %v579_v2 }
  0x1e   : > { %252 = vperm.xlu0 %541, %v217_v5  }
  0x1f   : > { %296 = vperm.xlu2 %540, %v278_v6   ;;  %542 = vset.pattern.permute.xlu1 %v579_v2 }
  0x20   : > { %248 = vperm.xlu1 %542, %v635_v4  }
  0x26   : > { %544 = vset.pattern.permute.xlu0 %v580_v3 }
  0x27   : > { %286 = vperm.xlu2 %540, %v276_v7   ;;  %281 = vperm.xlu0 %544, %v275_v23  }
  0x28   : > { %543 = vset.pattern.permute.xlu1 %v580_v3 }
  0x29   : > { %291 = vperm.xlu1 %543, %v277_v21  }
  0x2f   : > { %367 = vperm.xlu2 %540, %v508_v8   ;;  %545 = vset.pattern.permute.xlu0 %v581_v60 }
  0x30   : > { %422 = vperm.xlu0 %545, %v635_v4  }
  0x31   : > { %372 = vperm.xlu1 %543, %v509_v31  }
  0x37   : > { %357 = vperm.xlu2 %540, %v506_v9  }
  0x39   : > { %362 = vperm.xlu1 %543, %v507_v36  }
  0x68   : > { %v257_v15 = vpop.permute.xlu2 %256 }
  0x71   : > { %v223_v22 = vpop.permute.xlu2 %222 }
  0x72   : > { %v243_v24 = vmul.f32 %v546_v10, %v223_v22 }
  0x79   : > { %v297_v40 = vpop.permute.xlu2 %296 }
  0x7f   : > { %v238_v11 = vpop.permute.xlu0 %237 }
  0x80   : > { %v246_v12 = vmul.f32 %v546_v10, %v238_v11  ;;  %v261_v13 = vpop.permute.xlu1 %260  ;;  %v420_v11 = vld [vmem:[%s712_s2] sm:$0x1] }
  0x81   : > { %v287_v48 = vpop.permute.xlu2 %286 }
  0x82   : > { %v266_v14 = vadd.f32 %v261_v13, %v246_v12 }
  0x84   : > { %547 = vtanh.f32 %v266_v14 }
  0x87   : > { %v233_v16 = vpop.permute.xlu0 %232 }
  0x88   : > { %v245_v17 = vmul.f32 %v546_v10, %v233_v16 }
  0x89   : > { %v228_v18 = vpop.permute.xlu1 %227  ;;  %v368_v63 = vpop.permute.xlu2 %367 }
  0x8a   : > { %v548_v19 = vpop.eup %547  ;;  %v265_v20 = vadd.f32 %v257_v15, %v245_v17  ;;  %v244_v25 = vmul.f32 %v546_v10, %v228_v18 }
  0x8b   : > { %324 = vmatpush.msra.mxu0 %v548_v19  ;;  %517 = vmatpush.msra.mxu3 %v548_v19 }
  0x8c   : > { %549 = vtanh.f32 %v265_v20 }
  0x90   : > { %v253_v26 = vpop.permute.xlu0 %252 }
  0x91   : > { %v264_v27 = vadd.f32 %v253_v26, %v244_v25  ;;  %v358_v7 = vpop.permute.xlu2 %357 }
  0x92   : > { %v550_v28 = vpop.eup %549  ;;  %v249_v29 = vpop.permute.xlu1 %248 }
  0x93   : > { %551 = vtanh.f32 %v264_v27  ;;  %v263_v30 = vadd.f32 %v249_v29, %v243_v24  ;;  %325 = vmatpush.msra.mxu0 %v550_v28  ;;  %518 = vmatpush.msra.mxu3 %v550_v28 }
  0x95   : > { %553 = vtanh.f32 %v263_v30 }
  0x99   : > { %v552_v32 = vpop.eup %551  ;;  %v282_v42 = vpop.permute.xlu0 %281 }
  0x9a   : > { %326 = vmatpush.msra.mxu0 %v552_v32  ;;  %519 = vmatpush.msra.mxu3 %v552_v32 }
  0x9b   : > { %v554_v35 = vpop.eup %553  ;;  %v292_v44 = vpop.permute.xlu1 %291 }
  0x9c   : > { %327 = vmatpush.msra.mxu0 %v554_v35  ;;  %520 = vmatpush.msra.mxu3 %v554_v35 }
  0x9d   : > { %499 = vmatmul.msk.f32.vlgmr.msra.gmra.mxu3 %vm299_vm0, %v272_v33  ;;  %498 = vmatmul.msk.f32.vlgmr.msra.gmra.mxu0 %vm299_vm0, %v271_v34 }
  0xa2   : > { %v423_v13 = vpop.permute.xlu0 %422 }
  0xa3   : > { %v373_v61 = vpop.permute.xlu1 %372 }
  0xa5   : > { %500 = vmatmul.msk.f32.gmra.mxu3 %vm299_vm0, %v273_v37 }
  0xab   : > { %v363_v3 = vpop.permute.xlu1 %362 }
  0xad   : > { %501 = vmatmul.msk.f32.gmra.mxu3 %vm299_vm0, %v274_v38 }
 0x11a   : > { %v329_v43 = vpop.f32.mrf.mxu0 }
 0x11b   : > { %v330_v49 = vadd.f32 %v329_v43, %v282_v42 }
 0x120   : > { %v332_v39 = vpop.f32.mrf.mxu3 }
 0x121   : > { %v333_v50 = vadd.f32 %v332_v39, %v287_v48 }
 0x128   : > { %v335_v41 = vpop.f32.mrf.mxu3 }
 0x129   : > { %v336_v46 = vadd.f32 %v335_v41, %v292_v44 }
 0x130   : > { %v338_v45 = vpop.f32.mrf.mxu3 }
 0x131   : > { %v339_v47 = vadd.f32 %v338_v45, %v297_v40 }
 0x133   : > { %555 = vtanh.f32 %v339_v47 }
 0x134   : > { %557 = vtanh.f32 %v336_v46 }
 0x135   : > { %559 = vtanh.f32 %v330_v49 }
 0x136   : > { %561 = vtanh.f32 %v333_v50 }
 0x139   : > { %v556_v51 = vpop.eup %555 }
 0x13a   : > { %399 = vmatpush.msrb.mxu0 %v556_v51  ;;  %521 = vmatpush.msra.mxu1 %v556_v51  ;;  %v558_v52 = vpop.eup %557 }
 0x13b   : > { %v560_v53 = vpop.eup %559 }
 0x13c   : > { %400 = vmatpush.msrb.mxu0 %v558_v52  ;;  %522 = vmatpush.msra.mxu1 %v558_v52  ;;  %v562_v54 = vpop.eup %561 }
 0x13e   : > { %401 = vmatpush.msrb.mxu0 %v562_v54  ;;  %523 = vmatpush.msra.mxu1 %v562_v54 }
 0x140   : > { %402 = vmatpush.msrb.mxu0 %v560_v53  ;;  %524 = vmatpush.msra.mxu1 %v560_v53 }
 0x141   : > { %510 = vmatmul.msk.f32.vlgmr.msrb.gmra.mxu0 %vm299_vm0, %v502_v55  ;;  %511 = vmatmul.msk.f32.vlgmr.msra.gmra.mxu1 %vm299_vm0, %v503_v56 }
 0x149   : > { %512 = vmatmul.msk.f32.gmra.mxu1 %vm299_vm0, %v504_v57 }
 0x151   : > { %513 = vmatmul.msk.f32.gmra.mxu1 %vm299_vm0, %v505_v58 }
 0x1be   : > { %v407_v59 = vpop.f32.mrf.mxu1  ;;  %v404_v5 = vpop.f32.mrf.mxu0 }
 0x1bf   : > { %v408_v6 = vadd.f32 %v407_v59, %v363_v3  ;;  %v405_v8 = vadd.f32 %v404_v5, %v358_v7 }
 0x1c6   : > { %v410_v62 = vpop.f32.mrf.mxu1 }
 0x1c7   : > { %v411_v1 = vadd.f32 %v410_v62, %v368_v63 }
 0x1ce   : > { %v413_v0 = vpop.f32.mrf.mxu1 }
 0x1cf   : > { %v414_v2 = vadd.f32 %v413_v0, %v373_v61 }
 0x1d1   : > { %563 = vtanh.f32 %v414_v2 }
 0x1d2   : > { %565 = vtanh.f32 %v411_v1 }
 0x1d3   : > { %567 = vtanh.f32 %v408_v6 }
 0x1d4   : > { %569 = vtanh.f32 %v405_v8 }
 0x1d7   : > { %v564_v9 = vpop.eup %563 }
 0x1d8   : > { %440 = vmatpush.msra.mxu2 %v564_v9  ;;  %v566_v10 = vpop.eup %565 }
 0x1d9   : > { %v568_v4 = vpop.eup %567 }
 0x1da   : > { %441 = vmatpush.msra.mxu2 %v566_v10  ;;  %v570_v12 = vpop.eup %569 }
 0x1dc   : > { %442 = vmatpush.msra.mxu2 %v568_v4 }
 0x1de   : > { %443 = vmatpush.msra.mxu2 %v570_v12 }
 0x1df   : > { %514 = vmatmul.msk.f32.vlgmr.msra.gmra.mxu2 %vm299_vm0, %v420_v11 }
 0x262   : > { %v445_v14 = vpop.f32.mrf.mxu2 }
 0x263   : > { %v446_v15 = vadd.f32 %v445_v14, %v423_v13 }
 0x265   : > { %448 = vst [vmem:[%s214_s21] sm:$0x1] %v446_v15 }
 0x266 PF: > { %s15_s18 = sadd.s32 1, %s577_s18  }
 0x267   : > { %p12_p4 = scmp.ge.s32.totalorder %s15_s18, 4  }
 0x269   :  { %14 = sbr.rel (!%p12_p4) target bundleno = 1 (0x1), region = 72 }

</bundles_post_ra>
